<compile_context>
chip_gen: v7x
topology: tpu7x:2x2x1
jax: 0.10.0
libtpu: 0.0.40
codegen_flags: <defaults>
</compile_context>

<pallas_src>
import functools

import jax
import jax.numpy as jnp
from jax.experimental import pallas as pl
from jax.experimental.pallas import tpu as pltpu

EPS = 1e-06
_LANE = 128
_SUBLANE = 8


def _round_up(v, m):
    return (v + m - 1) // m * m


def _gem_kernel(p_ref, x_ref, o_ref, *, static_p=None):
    # p_ref: SMEM (1,) float32 -- learned exponent
    # x_ref: VMEM (TR, S) -- TR rows of (n, c), S = H*W spatial elems
    # o_ref: VMEM (TR, 1) float32 -- pooled output per (n, c)
    x = x_ref[...].astype(jnp.float32)
    x = jnp.maximum(x, EPS)                      # clamp(min=eps) -> x > 0

    if static_p is None:
        p = p_ref[0]
        inv_p = 1.0 / p
        # x > 0, so x**p == exp(p * log(x)); avoids the generic pow lowering's
        # extra compares/selects on the VPU.
        xp = jnp.exp(p * jnp.log(x))
    else:
        inv_p = 1.0 / float(static_p)
        xp = x ** int(static_p)                  # repeated multiplies, no EUP

    m = jnp.mean(xp, axis=-1, keepdims=True)     # avg_pool2d over full (H, W)
    # finalizer m ** (1/p) only runs on (TR, 1) elements -> negligible cost
    o_ref[...] = jnp.exp(jnp.log(m) * inv_p).astype(o_ref.dtype)


def gem_pallas(x, p, *, static_p=None, rows_per_tile=None):
    """x: (N, C, H, W), p: (1,) float32 -> (N, C, 1, 1) float32."""
    N, C, H, W = x.shape
    R, S = N * C, H * W
    x2 = x.reshape(R, S)
    p = p.astype(jnp.float32).reshape(1)

    # Pick a row tile: keep each double-buffered input tile around <= 4 MiB so
    # 2 buffers stay well under the scoped-VMEM default on v5e/v6e/v7x.
    s_pad = _round_up(S, _LANE)
    if rows_per_tile is None:
        budget_bytes = 4 * 1024 * 1024
        tr = budget_bytes // (s_pad * 4)
        tr = max(_SUBLANE, (tr // _SUBLANE) * _SUBLANE)
        tr = min(tr, 1024)
    else:
        tr = _round_up(rows_per_tile, _SUBLANE)
    tr = min(tr, _round_up(R, _SUBLANE))

    grid = (pl.cdiv(R, tr),)
    kernel = functools.partial(_gem_kernel, static_p=static_p)

    out = pl.pallas_call(
        kernel,
        out_shape=jax.ShapeDtypeStruct((R, 1), jnp.float32),
        grid=grid,
        in_specs=[
            pl.BlockSpec(memory_space=pltpu.SMEM),        # p scalar (whole array)
            pl.BlockSpec((tr, S), lambda i: (i, 0)),      # row tile of x
        ],
        out_specs=pl.BlockSpec((tr, 1), lambda i: (i, 0)),
        compiler_params=pltpu.CompilerParams(
            dimension_semantics=("parallel",),            # megacore on v7x
            vmem_limit_bytes=32 * 1024 * 1024,
        ),
    )(p, x2)

    return out.reshape(N, C, 1, 1)


def gem_ref(x, p):
    # pure-JAX reference mirroring the PyTorch forward
    xp = jnp.power(jnp.clip(x, EPS), p[0])
    m = jnp.mean(xp, axis=(-2, -1), keepdims=True)
    return jnp.power(m, 1.0 / p[0])


if __name__ == "__main__":
    key = jax.random.PRNGKey(0)
    x = jax.random.normal(key, (2, 4, 16, 16), dtype=jnp.float32)
    # GeM.__init__: self.p = Parameter(torch.ones(1) * 3)
    p = jnp.ones((1,), dtype=jnp.float32) * 3.0

    y = gem_pallas(x, p)
    jax.block_until_ready(y)

    y_ref = gem_ref(x, p)
    assert y.shape == (2, 4, 1, 1)
    assert jnp.allclose(y, y_ref, rtol=1e-4, atol=1e-5)

    # static-p fast path (p known at trace time, e.g. inference with p=3)
    y_static = gem_pallas(x, p, static_p=3)
    jax.block_until_ready(y_static)
    assert jnp.allclose(y_static, y_ref, rtol=1e-4, atol=1e-5)

    print("KERNEL_OK")
</pallas_src>

<mosaic_0001>
module attributes {stable_mosaic.version = 11 : i64} {
  func.func @_gem_kernel(%arg0: i32, %arg1: memref<1xf32, #tpu.memory_space<smem>>, %arg2: memref<8x256xf32, #tpu.memory_space<vmem>>, %arg3: memref<8x1xf32, #tpu.memory_space<vmem>>) attributes {dimension_semantics = [#tpu.dimension_semantics<parallel>], iteration_bounds = array<i64: 1>, scalar_prefetch = 0 : i64, scratch_operands = 0 : i64, tpu.core_type = #tpu.core_type<tc>, window_params = [{transform_indices = @transform_0, window_bounds = array<i64: 1>}, {transform_indices = @transform_1, window_bounds = array<i64: 8, 256>}, {transform_indices = @transform_2, window_bounds = array<i64: 8, 1>}]} {
    %c0 = arith.constant 0 : index
    %c0_0 = arith.constant 0 : index
    %0 = vector.load %arg2[%c0, %c0_0] : memref<8x256xf32, #tpu.memory_space<vmem>>, vector<8x256xf32>
    %cst = arith.constant 9.99999997E-7 : f32
    %1 = vector.broadcast %cst : f32 to vector<8x256xf32>
    %2 = arith.maximumf %0, %1 : vector<8x256xf32>
    %c0_1 = arith.constant 0 : index
    %3 = memref.load %arg1[%c0_1] : memref<1xf32, #tpu.memory_space<smem>>
    %cst_2 = arith.constant 1.000000e+00 : f32
    %4 = arith.divf %cst_2, %3 : f32
    %5 = math.log %2 : vector<8x256xf32>
    %6 = vector.broadcast %3 : f32 to vector<8x256xf32>
    %7 = arith.mulf %6, %5 : vector<8x256xf32>
    %8 = math.exp %7 : vector<8x256xf32>
    %cst_3 = arith.constant dense<0.000000e+00> : vector<8xf32>
    %9 = vector.multi_reduction <add>, %8, %cst_3 [1] : vector<8x256xf32> to vector<8xf32>
    %10 = vector.shape_cast %9 : vector<8xf32> to vector<8x1xf32>
    %cst_4 = arith.constant 2.560000e+02 : f32
    %11 = vector.broadcast %cst_4 : f32 to vector<8x1xf32>
    %12 = arith.divf %10, %11 : vector<8x1xf32>
    %13 = math.log %12 : vector<8x1xf32>
    %14 = vector.broadcast %4 : f32 to vector<8x1xf32>
    %15 = arith.mulf %13, %14 : vector<8x1xf32>
    %16 = math.exp %15 : vector<8x1xf32>
    %c0_5 = arith.constant 0 : index
    %c0_6 = arith.constant 0 : index
    %17 = vector.load %arg3[%c0_5, %c0_6] : memref<8x1xf32, #tpu.memory_space<vmem>>, vector<8x1xf32>
    tpu.vector_store %arg3[%c0_5, %c0_6], %16 {strides = array<i32>} : memref<8x1xf32, #tpu.memory_space<vmem>>, vector<8x1xf32>,
    return
  }
  func.func @transform_0(%arg0: i32) -> i32 {
    %c0_i32 = arith.constant 0 : i32
    %c0_i32_0 = arith.constant 0 : i32
    return %c0_i32 : i32
  }
  func.func @transform_1(%arg0: i32) -> (i32, i32) {
    %c0_i32 = arith.constant 0 : i32
    %c0_i32_0 = arith.constant 0 : i32
    return %arg0, %c0_i32 : i32, i32
  }
  func.func @transform_2(%arg0: i32) -> (i32, i32) {
    %c0_i32 = arith.constant 0 : i32
    %c0_i32_0 = arith.constant 0 : i32
    return %arg0, %c0_i32 : i32, i32
  }
}

</mosaic_0001>

<bundles_post_ra>
// kernel: tpu_custom_call.1
= control target key start
LH: loop header
LB: loop body
LE: loop exit
PB: predicated region body
PF: predicated region fallthrough
CT: control target
= control target key end

     0   :  { %8 = vsyncpa [#allocation4], 0  ;;  %s102_s9 = smov [#allocation3]   ;;  %s136_s0 = inlined_call_operand.<no memory space> [shape: f32[1], index: 0, kind: input, shape index: {}]   ;;  %s137_s1 = inlined_call_operand.hbm [shape: f32[8,256], index: 1, kind: input, shape index: {}]   ;;  %s138_s2 = inlined_call_operand.vmem [shape: f32[8,1], index: 2, kind: output, shape index: {}]  }
   0x1   :  { %s17_s10 = sshll.u32 %s102_s9, 4  ;;  %s78_s13 = scalar_lea.hbm %s137_s1, 256  ;;  %s18_s10 = int_to_ptr.vmem [resolvable:$true] %s17_s10 }
   0x2   :  { %p79_p0 = scmp.ne.s32.totalorder %s137_s1, %s78_s13  ;;  %p82_p1 = scmp.lt.u32.totalorder %s78_s13, %s137_s1 }
   0x4   :  { %p84_p2 = pnand %p82_p1, %p79_p0 }
   0x6   :  { %87 = shalt.err (!%p84_p2)
}
   0x7   :  { %s88_s18 = scalar_lea.vmem %s18_s10, 256  ;;  %p93_p4 = scmp.lt.s32.totalorder %s18_s10, %s18_s10 }
   0x8   :  { %p89_p3 = scmp.ne.s32.totalorder %s18_s10, %s88_s18  ;;  %p94_p5 = scmp.lt.s32.totalorder %s88_s18, %s88_s18 }
   0xa   :  { %p95_p6 = por %p94_p5, %p93_p4 }
   0xc   :  { %p96_p7 = pnand %p95_p6, %p89_p3 }
   0xe   :  { %99 = shalt.err (!%p96_p7)
}
   0xf   :  { %20 = dma.hbm_to_vmem [thread:$0]  %s137_s1, 256, %s18_s10, [#allocation4]  }
  0x10   :  { %100 = dma.done.wait [#allocation4], 256  }
  0x11   :  { %101 = vsyncadd [#allocation4], 4294967040  ;;  %v29_v0 = vstv %s136_s0  ;;  %v24_v1 = vld [vmem:[#allocation3] sm:$0xff]  ;;  %v25_v2 = vld [vmem:[#allocation3 + $0x8] sm:$0xff]  ;;  %vm54_vm0 = vcmask 7168  }
  0x12   :  { %64 = vrcp.f32 %v29_v0  ;;  %v26_v3 = vmax.f32 %v24_v1, 1e-06  ;;  %v27_v4 = vmax.f32 %v25_v2, 1e-06 }
  0x14   :  { %66 = vlog2.f32 %v26_v3 }
  0x15   :  { %68 = vlog2.f32 %v27_v4 }
  0x1c   :  { %v65_v5 = vpop.eup %64 }
  0x1d   :  { %61 = vpush %v65_v5 }
  0x1e   :  { %v67_v6 = vpop.eup %66 }
  0x1f   :  { %v69_v7 = vpop.eup %68  ;;  %v33_v8 = vmul.f32 0.6931472, %v67_v6 }
  0x20   :  { %v35_v9 = vmul.f32 0.6931472, %v69_v7 }
  0x21   :  { %v37_v10 = vmul.f32 %v33_v8, %v29_v0 }
  0x22   :  { %v38_v11 = vmul.f32 %v35_v9, %v29_v0 }
  0x23   :  { %v39_v12 = vmul.f32 1.442695, %v37_v10 }
  0x24   :  { %v41_v13 = vmul.f32 1.442695, %v38_v11 }
  0x25   :  { %70 = vpow2.f32 %v39_v12 }
  0x26   :  { %72 = vpow2.f32 %v41_v13 }
  0x2f   :  { %v71_v14 = vpop.eup %70 }
  0x30   :  { %v73_v15 = vpop.eup %72 }
  0x31   :  { %v43_v16 = vadd.f32 %v73_v15, %v71_v14 }
  0x33   :  { %44 = vadd.xlane.f32.xlu0 %v43_v16 }
  0x4e   :  { %s62_s0 = spop %61 }
  0x4f   :  { %v50_v20 = vstv %s62_s0 }
  0xc0   :  { %v45_v17 = vpop.xlane.xlu0 %44 }
  0xc1   :  { %v47_v18 = vmul.f32 0.00390625, %v45_v17 }
  0xc3   :  { %74 = vlog2.f32 %v47_v18 }
  0xcd   :  { %v75_v19 = vpop.eup %74 }
  0xce   :  { %v49_v21 = vmul.f32 0.6931472, %v75_v19 }
  0xd0   :  { %v51_v22 = vmul.f32 %v50_v20, %v49_v21 }
  0xd2   :  { %v52_v23 = vmul.f32 1.442695, %v51_v22 }
  0xd4   :  { %76 = vpow2.f32 %v52_v23 }
  0xde   :  { %v77_v24 = vpop.eup %76 }
  0xdf   :  { %55 = vst.msk [vmem:[%s138_s2] sm:$0xff] %vm54_vm0, %v77_v24 }
  0xe0   :  { %60 = vsyncpa [#allocation4], 1 }

</bundles_post_ra>
